<compile_context>
chip_gen: v6e
topology: v6e:2x2x1
jax: 0.10.0
libtpu: 0.0.40
codegen_flags: <defaults>
</compile_context>

<pallas_src>
import math

import jax
import jax.numpy as jnp
from jax.experimental import pallas as pl
from jax.experimental.pallas import tpu as pltpu


def _round_up(n, m):
    return ((n + m - 1) // m) * m


# ----------------------------- kernels ------------------------------------- #

def _tokenizer_bias_kernel(x_ref, w_ref, b_ref, out_ref):
    """out[b, f, :] = w[f, :] * x[b, f] + b[f, :] for one batch tile."""
    x = x_ref[...]                                        # (TB, F)      f32
    tok = x[:, :, None] * w_ref[...][None] + b_ref[...][None]   # (TB, F, D)
    out_ref[...] = tok.astype(out_ref.dtype)              # single full-tile store


def _tokenizer_nobias_kernel(x_ref, w_ref, out_ref):
    """bias=False path: multiplication only."""
    x = x_ref[...]                                        # (TB, F)
    tok = x[:, :, None] * w_ref[...][None]                # (TB, F, D)
    out_ref[...] = tok.astype(out_ref.dtype)


# --------------------------- tiling heuristics ------------------------------ #

def _vmem_limit_bytes():
    """Generation-aware scoped-VMEM limit: 0.75 * physical VMEM, capped at 112 MiB.

    v7x: 64 MiB physical -> ~48 MiB limit.  v5e/v6e: 128 MiB -> ~96 MiB limit.
    """
    try:
        cap = int(getattr(pltpu.get_tpu_info(), "vmem_capacity_bytes", 0)) or (64 << 20)
    except Exception:
        cap = 64 << 20          # conservative fallback (v7x per-TC physical)
    return min(int(cap * 0.75), 112 << 20)


def _pick_batch_tile(B, F, D_pad, *, x_itemsize, out_itemsize, has_bias, sub,
                     vmem_budget):
    """Largest sublane-aligned batch tile whose double-buffered blocks (x, out,
    and the resident weight/bias) fit in `vmem_budget`, nudged so the step
    count is even when >1 (so v7x's 2 TensorCores split the grid evenly)."""
    n_params = 2 if has_bias else 1
    # weight/bias: (F, D_pad) f32, double-buffered by the pipeline (constant
    # index_map -> fetched once, but 2 buffers are still allocated).
    fixed = n_params * 2 * _round_up(F, 8) * D_pad * 4
    # per-batch-row bytes, x2 pipeline buffers each, padded to (8, 128) tiles.
    per_row = 2 * (_round_up(F, 8) * D_pad * out_itemsize      # output block
                   + _round_up(F, 128) * x_itemsize)           # x block
    cap_rows = max(sub, (vmem_budget - fixed) // per_row)
    cap_rows = max(sub, (cap_rows // sub) * sub)
    tb = min(_round_up(B, sub), cap_rows)
    tb = max(sub, (tb // sub) * sub)
    # even number of grid steps when tiled (harmless on 1-TC chips).
    while tb > sub:
        steps = -(-B // tb)
        if steps == 1 or steps % 2 == 0:
            break
        tb -= sub
    return tb


# ------------------------------- wrapper ------------------------------------ #

def numerical_feature_tokenizer(x, weight, bias=None, *, tb=None, out_dtype=None):
    """Pallas forward of NumericalFeatureTokenizer.

    x:      (B, n_features)
    weight: (n_features, d_token)
    bias:   (n_features, d_token) or None  (bias=False in the module)
    returns (B, n_features, d_token), dtype = out_dtype (default: x.dtype; pass
    jnp.bfloat16 to halve the dominant HBM write traffic — compute stays f32).
    """
    B, F = x.shape
    Fw, D = weight.shape
    assert Fw == F, "weight must be (n_features, d_token)"
    if out_dtype is None:
        out_dtype = x.dtype

    # Lane-dense output: pad d_token to a multiple of the 128-lane vreg width so
    # stores are unmasked vst (e.g. FT-Transformer's d_token=192 -> 256).
    D_pad = _round_up(D, 128)
    if D_pad != D:
        weight = jnp.pad(weight, ((0, 0), (0, D_pad - D)))
        if bias is not None:
            bias = jnp.pad(bias, ((0, 0), (0, D_pad - D)))

    vmem_limit = _vmem_limit_bytes()
    # sublane packing of the x block's second-to-last dim (8 for f32, 16 for bf16)
    sub = 8 * max(1, 4 // jnp.dtype(x.dtype).itemsize)
    if tb is None:
        tb = _pick_batch_tile(
            B, F, D_pad,
            x_itemsize=jnp.dtype(x.dtype).itemsize,
            out_itemsize=jnp.dtype(out_dtype).itemsize,
            has_bias=bias is not None,
            sub=sub,
            vmem_budget=int(vmem_limit * 0.75),
        )
    n_steps = pl.cdiv(B, tb)   # ragged final block is masked by Pallas

    in_specs = [
        pl.BlockSpec((tb, F), lambda i: (i, 0)),        # x: streamed over batch
        pl.BlockSpec((F, D_pad), lambda i: (0, 0)),     # weight: VMEM-resident
    ]
    operands = [x, weight]
    if bias is not None:
        in_specs.append(pl.BlockSpec((F, D_pad), lambda i: (0, 0)))  # bias resident
        operands.append(bias)
        kernel = _tokenizer_bias_kernel
    else:
        kernel = _tokenizer_nobias_kernel

    out = pl.pallas_call(
        kernel,
        out_shape=jax.ShapeDtypeStruct((B, F, D_pad), out_dtype),
        grid_spec=pltpu.PrefetchScalarGridSpec(
            num_scalar_prefetch=0,
            grid=(n_steps,),
            in_specs=in_specs,
            out_specs=pl.BlockSpec((tb, F, D_pad), lambda i: (i, 0, 0)),
        ),
        compiler_params=pltpu.CompilerParams(
            dimension_semantics=("parallel",),
            vmem_limit_bytes=vmem_limit,
        ),
    )(*operands)

    if D_pad != D:
        out = out[:, :, :D]
    return out


# -------------------------------- test -------------------------------------- #

if __name__ == "__main__":
    # Module config: NumericalFeatureTokenizer(n_features, d_token, bias=True, 'uniform')
    B = 64            # n_objects
    n_features = 8    # continuous features
    d_token = 192     # common FT-Transformer size: exercises 128-lane padding

    key = jax.random.PRNGKey(0)
    k_x, k_w, k_b = jax.random.split(key, 3)

    # 'uniform' initialization: Uniform(-1/sqrt(d), 1/sqrt(d))
    s = 1.0 / math.sqrt(d_token)
    weight = jax.random.uniform(k_w, (n_features, d_token), jnp.float32, -s, s)
    bias = jax.random.uniform(k_b, (n_features, d_token), jnp.float32, -s, s)
    x = jax.random.normal(k_x, (B, n_features), jnp.float32)

    # pure-JAX reference mirroring the PyTorch forward
    ref = weight[None] * x[..., None] + bias[None]        # (B, F, D)

    # 1) main path (auto tile, lane-padded d_token)
    tokens = jax.block_until_ready(numerical_feature_tokenizer(x, weight, bias))
    assert tokens.shape == (B, n_features, d_token)
    assert jnp.allclose(tokens, ref, atol=1e-6, rtol=1e-6)

    # 2) bias=False path (multiplication only, specialized kernel)
    tok_nb = jax.block_until_ready(numerical_feature_tokenizer(x, weight, None))
    assert jnp.allclose(tok_nb, weight[None] * x[..., None], atol=1e-6, rtol=1e-6)

    # 3) ragged batch + forced small tile: exercises the cdiv grid / masked tail
    xr = x[:56]
    tok_r = jax.block_until_ready(numerical_feature_tokenizer(xr, weight, bias, tb=16))
    assert tok_r.shape == (56, n_features, d_token)
    assert jnp.allclose(tok_r, ref[:56], atol=1e-6, rtol=1e-6)

    # 4) bf16 tokens: halves HBM write traffic; compute is f32, cast at the store
    tok_bf = jax.block_until_ready(
        numerical_feature_tokenizer(x, weight, bias, out_dtype=jnp.bfloat16))
    assert tok_bf.dtype == jnp.bfloat16
    assert jnp.allclose(tok_bf.astype(jnp.float32), ref, atol=5e-3, rtol=2e-2)

    print("KERNEL_OK")
</pallas_src>

<mosaic_0001>
module attributes {stable_mosaic.version = 11 : i64} {
  func.func @_tokenizer_bias_kernel(%arg0: i32, %arg1: memref<64x8xf32, #tpu.memory_space<vmem>>, %arg2: memref<8x256xf32, #tpu.memory_space<vmem>>, %arg3: memref<8x256xf32, #tpu.memory_space<vmem>>, %arg4: memref<64x8x256xf32, #tpu.memory_space<vmem>>) attributes {dimension_semantics = [#tpu.dimension_semantics<parallel>], iteration_bounds = array<i64: 1>, scalar_prefetch = 0 : i64, scratch_operands = 0 : i64, tpu.core_type = #tpu.core_type<tc>, window_params = [{transform_indices = @transform_0, window_bounds = array<i64: 64, 8>}, {pipeline_mode = #tpu.pipeline_mode<synchronous>, transform_indices = @transform_1, window_bounds = array<i64: 8, 256>}, {pipeline_mode = #tpu.pipeline_mode<synchronous>, transform_indices = @transform_2, window_bounds = array<i64: 8, 256>}, {transform_indices = @transform_3, window_bounds = array<i64: 64, 8, 256>}]} {
    %c0 = arith.constant 0 : index
    %c0_0 = arith.constant 0 : index
    %0 = vector.load %arg1[%c0, %c0_0] : memref<64x8xf32, #tpu.memory_space<vmem>>, vector<64x8xf32>
    %1 = vector.shape_cast %0 : vector<64x8xf32> to vector<64x8x1xf32>
    %c0_1 = arith.constant 0 : index
    %c0_2 = arith.constant 0 : index
    %2 = vector.load %arg2[%c0_1, %c0_2] : memref<8x256xf32, #tpu.memory_space<vmem>>, vector<8x256xf32>
    %3 = vector.shape_cast %2 : vector<8x256xf32> to vector<1x8x256xf32>
    %4 = vector.broadcast %1 : vector<64x8x1xf32> to vector<64x8x256xf32>
    %5 = vector.broadcast %3 : vector<1x8x256xf32> to vector<64x8x256xf32>
    %6 = arith.mulf %4, %5 : vector<64x8x256xf32>
    %c0_3 = arith.constant 0 : index
    %c0_4 = arith.constant 0 : index
    %7 = vector.load %arg3[%c0_3, %c0_4] : memref<8x256xf32, #tpu.memory_space<vmem>>, vector<8x256xf32>
    %8 = vector.shape_cast %7 : vector<8x256xf32> to vector<1x8x256xf32>
    %9 = vector.broadcast %8 : vector<1x8x256xf32> to vector<64x8x256xf32>
    %10 = arith.addf %6, %9 : vector<64x8x256xf32>
    %c0_5 = arith.constant 0 : index
    %c0_6 = arith.constant 0 : index
    %c0_7 = arith.constant 0 : index
    %11 = vector.load %arg4[%c0_5, %c0_6, %c0_7] : memref<64x8x256xf32, #tpu.memory_space<vmem>>, vector<64x8x256xf32>
    tpu.vector_store %arg4[%c0_5, %c0_6, %c0_7], %10 {strides = array<i32>} : memref<64x8x256xf32, #tpu.memory_space<vmem>>, vector<64x8x256xf32>,
    return
  }
  func.func @transform_0(%arg0: i32) -> (i32, i32) {
    %c0_i32 = arith.constant 0 : i32
    %c0_i32_0 = arith.constant 0 : i32
    return %arg0, %c0_i32 : i32, i32
  }
  func.func @transform_1(%arg0: i32) -> (i32, i32) {
    %c0_i32 = arith.constant 0 : i32
    %c0_i32_0 = arith.constant 0 : i32
    %c0_i32_1 = arith.constant 0 : i32
    return %c0_i32, %c0_i32_0 : i32, i32
  }
  func.func @transform_2(%arg0: i32) -> (i32, i32) {
    %c0_i32 = arith.constant 0 : i32
    %c0_i32_0 = arith.constant 0 : i32
    %c0_i32_1 = arith.constant 0 : i32
    return %c0_i32, %c0_i32_0 : i32, i32
  }
  func.func @transform_3(%arg0: i32) -> (i32, i32, i32) {
    %c0_i32 = arith.constant 0 : i32
    %c0_i32_0 = arith.constant 0 : i32
    %c0_i32_1 = arith.constant 0 : i32
    return %arg0, %c0_i32, %c0_i32_0 : i32, i32, i32
  }
}

</mosaic_0001>

<bundles_post_ra>
// kernel: tpu_custom_call.1
= control target key start
LH: loop header
LB: loop body
LE: loop exit
PB: predicated region body
PF: predicated region fallthrough
CT: control target
= control target key end

     0   :  { %v23_v0 = vlaneseq  ;;  %s1306_s0 = inlined_call_operand.vmem [shape: f32[64,8], index: 0, kind: input, shape index: {}]   ;;  %s1307_s1 = inlined_call_operand.vmem [shape: f32[8,256], index: 1, kind: input, shape index: {}]   ;;  %s1308_s2 = inlined_call_operand.vmem [shape: f32[8,256], index: 2, kind: input, shape index: {}]   ;;  %s1309_s3 = inlined_call_operand.hbm [shape: f32[64,8,256], index: 3, kind: output, shape index: {}]  }
   0x1   :  { %v15_v2 = vld [vmem:[%s1306_s0] sm:$0xff] }
   0x2   :  { %v24_v1 = vshrl.u32 %v23_v0, 7 }
   0x4   :  { %v926_v3 = vsub.s32 2, %v24_v1  ;;  %v928_v4 = vsub.s32 0, %v24_v1  ;;  %v930_v5 = vsub.s32 3, %v24_v1  ;;  %v932_v6 = vsub.s32 1, %v24_v1 }
   0x5   :  { %8 = vsyncpa [#allocation3], 0  ;;  %v938_v11 = vsub.s32 5, %v24_v1  ;;  %v940_v12 = vsub.s32 4, %v24_v1  ;;  %v944_v15 = vsub.s32 7, %v24_v1  ;;  %v946_v16 = vsub.s32 6, %v24_v1 }
   0x6   :  { %v40_v7 = vrot.slane %v15_v2, %v926_v3  ;;  %v26_v8 = vrot.slane %v15_v2, %v928_v4  ;;  %v47_v9 = vrot.slane %v15_v2, %v930_v5  ;;  %v33_v10 = vrot.slane %v15_v2, %v932_v6  ;;  %v16_v19 = vld [vmem:[%s1306_s0 + $0x8] sm:$0xff]  ;;  %v17_v28 = vld [vmem:[%s1306_s0 + $0x10] sm:$0xff]  ;;  %v18_v37 = vld [vmem:[%s1306_s0 + $0x18] sm:$0xff] }
   0x7   :  { %v61_v13 = vrot.slane %v15_v2, %v938_v11  ;;  %v54_v14 = vrot.slane %v15_v2, %v940_v12  ;;  %v75_v17 = vrot.slane %v15_v2, %v944_v15  ;;  %v68_v18 = vrot.slane %v15_v2, %v946_v16  ;;  %v19_v46 = vld [vmem:[%s1306_s0 + $0x20] sm:$0xff]  ;;  %v20_v55 = vld [vmem:[%s1306_s0 + $0x28] sm:$0xff]  ;;  %v21_v0 = vld [vmem:[%s1306_s0 + $0x30] sm:$0xff] }
   0x8   :  { %42 = vbcast.lane.b32.xlu1 %v40_v7, 256  ;;  %28 = vbcast.lane.b32.xlu0 %v26_v8, 256  ;;  %v89_v20 = vrot.slane %v16_v19, %v932_v6  ;;  %v82_v21 = vrot.slane %v16_v19, %v928_v4  ;;  %v103_v22 = vrot.slane %v16_v19, %v930_v5 }
   0x9   :  { %v96_v23 = vrot.slane %v16_v19, %v926_v3  ;;  %v117_v24 = vrot.slane %v16_v19, %v938_v11  ;;  %v110_v25 = vrot.slane %v16_v19, %v940_v12  ;;  %v131_v26 = vrot.slane %v16_v19, %v944_v15 }
   0xa   :  { %v124_v27 = vrot.slane %v16_v19, %v946_v16  ;;  %v145_v29 = vrot.slane %v17_v28, %v932_v6  ;;  %v138_v30 = vrot.slane %v17_v28, %v928_v4  ;;  %v159_v31 = vrot.slane %v17_v28, %v930_v5 }
   0xb   :  { %v152_v32 = vrot.slane %v17_v28, %v926_v3  ;;  %v173_v33 = vrot.slane %v17_v28, %v938_v11  ;;  %v166_v34 = vrot.slane %v17_v28, %v940_v12  ;;  %v187_v35 = vrot.slane %v17_v28, %v944_v15 }
   0xc   :  { %49 = vbcast.lane.b32.xlu1 %v47_v9, 256  ;;  %35 = vbcast.lane.b32.xlu0 %v33_v10, 256  ;;  %v180_v36 = vrot.slane %v17_v28, %v946_v16  ;;  %v201_v38 = vrot.slane %v18_v37, %v932_v6  ;;  %v194_v39 = vrot.slane %v18_v37, %v928_v4 }
   0xd   :  { %v215_v40 = vrot.slane %v18_v37, %v930_v5  ;;  %v208_v41 = vrot.slane %v18_v37, %v926_v3  ;;  %v229_v42 = vrot.slane %v18_v37, %v938_v11  ;;  %v222_v43 = vrot.slane %v18_v37, %v940_v12 }
   0xe   :  { %v243_v44 = vrot.slane %v18_v37, %v944_v15  ;;  %v236_v45 = vrot.slane %v18_v37, %v946_v16  ;;  %v257_v47 = vrot.slane %v19_v46, %v932_v6  ;;  %v250_v48 = vrot.slane %v19_v46, %v928_v4 }
   0xf   :  { %v271_v49 = vrot.slane %v19_v46, %v930_v5  ;;  %v264_v50 = vrot.slane %v19_v46, %v926_v3  ;;  %v285_v51 = vrot.slane %v19_v46, %v938_v11  ;;  %v278_v52 = vrot.slane %v19_v46, %v940_v12 }
  0x10   :  { %63 = vbcast.lane.b32.xlu1 %v61_v13, 256  ;;  %56 = vbcast.lane.b32.xlu0 %v54_v14, 256  ;;  %v299_v53 = vrot.slane %v19_v46, %v944_v15  ;;  %v292_v54 = vrot.slane %v19_v46, %v946_v16  ;;  %v313_v56 = vrot.slane %v20_v55, %v932_v6 }
  0x11   :  { %v306_v57 = vrot.slane %v20_v55, %v928_v4  ;;  %v327_v58 = vrot.slane %v20_v55, %v930_v5  ;;  %v320_v59 = vrot.slane %v20_v55, %v926_v3  ;;  %v341_v60 = vrot.slane %v20_v55, %v938_v11 }
  0x12   :  { %v334_v61 = vrot.slane %v20_v55, %v940_v12  ;;  %v355_v62 = vrot.slane %v20_v55, %v944_v15  ;;  %v348_v63 = vrot.slane %v20_v55, %v946_v16  ;;  %v369_v1 = vrot.slane %v21_v0, %v932_v6 }
  0x13   :  { %v362_v2 = vrot.slane %v21_v0, %v928_v4  ;;  %v383_v7 = vrot.slane %v21_v0, %v930_v5  ;;  %v376_v8 = vrot.slane %v21_v0, %v926_v3  ;;  %v397_v9 = vrot.slane %v21_v0, %v938_v11 }
  0x14   :  { %77 = vbcast.lane.b32.xlu1 %v75_v17, 256  ;;  %70 = vbcast.lane.b32.xlu0 %v68_v18, 256  ;;  %v390_v10 = vrot.slane %v21_v0, %v940_v12  ;;  %v411_v13 = vrot.slane %v21_v0, %v944_v15  ;;  %v404_v14 = vrot.slane %v21_v0, %v946_v16  ;;  %v22_v17 = vld [vmem:[%s1306_s0 + $0x38] sm:$0xff] }
  0x15   :  { %v425_v18 = vrot.slane %v22_v17, %v932_v6  ;;  %v418_v19 = vrot.slane %v22_v17, %v928_v4  ;;  %v1036_v4 = vld [vmem:[%s1308_s2] sm:$0xff]  ;;  %v1041_v6 = vld [vmem:[%s1308_s2 + $0x8] sm:$0xff]  ;;  %v453_v28 = vrot.slane %v22_v17, %v938_v11 }
  0x18   :  { %91 = vbcast.lane.b32.xlu1 %v89_v20, 256  ;;  %84 = vbcast.lane.b32.xlu0 %v82_v21, 256  ;;  %v1024_v20 = vld [vmem:[%s1307_s1] sm:$0xff]  ;;  %v1029_v21 = vld [vmem:[%s1307_s1 + $0x8] sm:$0xff]  ;;  %s900_s1 = smov [#allocation2]  }
  0x19   :  { %s864_s2 = sshll.u32 %s900_s1, 4  ;;  %s865_s2 = int_to_ptr.vmem [resolvable:$true] %s864_s2 }
  0x1a   :  { %s878_s8 = scalar_lea.vmem %s865_s2, 16384  ;;  %p883_p1 = scmp.lt.s32.totalorder %s865_s2, %s865_s2 }
  0x1b   :  { %p879_p0 = scmp.ne.s32.totalorder %s865_s2, %s878_s8  ;;  %p884_p2 = scmp.lt.s32.totalorder %s878_s8, %s878_s8 }
  0x1c   :  { %105 = vbcast.lane.b32.xlu1 %v103_v22, 256  ;;  %98 = vbcast.lane.b32.xlu0 %v96_v23, 256  ;;  %v439_v22 = vrot.slane %v22_v17, %v930_v5  ;;  %v432_v23 = vrot.slane %v22_v17, %v926_v3 }
  0x1d   :  { %p885_p3 = por %p884_p2, %p883_p1 }
  0x1f   :  { %p886_p4 = pnand %p885_p3, %p879_p0 }
  0x20   :  { %119 = vbcast.lane.b32.xlu1 %v117_v24, 256  ;;  %112 = vbcast.lane.b32.xlu0 %v110_v25, 256 }
  0x24   :  { %133 = vbcast.lane.b32.xlu1 %v131_v26, 256  ;;  %126 = vbcast.lane.b32.xlu0 %v124_v27, 256 }
  0x28   :  { %147 = vbcast.lane.b32.xlu1 %v145_v29, 256  ;;  %140 = vbcast.lane.b32.xlu0 %v138_v30, 256  ;;  %v446_v29 = vrot.slane %v22_v17, %v940_v12 }
  0x2c   :  { %161 = vbcast.lane.b32.xlu1 %v159_v31, 256  ;;  %154 = vbcast.lane.b32.xlu0 %v152_v32, 256 }
  0x30   :  { %175 = vbcast.lane.b32.xlu1 %v173_v33, 256  ;;  %168 = vbcast.lane.b32.xlu0 %v166_v34, 256 }
  0x34   :  { %189 = vbcast.lane.b32.xlu1 %v187_v35, 256  ;;  %182 = vbcast.lane.b32.xlu0 %v180_v36, 256 }
  0x38   :  { %203 = vbcast.lane.b32.xlu1 %v201_v38, 256  ;;  %196 = vbcast.lane.b32.xlu0 %v194_v39, 256  ;;  %v467_v38 = vrot.slane %v22_v17, %v944_v15  ;;  %v460_v39 = vrot.slane %v22_v17, %v946_v16 }
  0x3c   :  { %217 = vbcast.lane.b32.xlu1 %v215_v40, 256  ;;  %210 = vbcast.lane.b32.xlu0 %v208_v41, 256 }
  0x40   :  { %231 = vbcast.lane.b32.xlu1 %v229_v42, 256  ;;  %224 = vbcast.lane.b32.xlu0 %v222_v43, 256 }
  0x44   :  { %245 = vbcast.lane.b32.xlu1 %v243_v44, 256  ;;  %238 = vbcast.lane.b32.xlu0 %v236_v45, 256 }
  0x48   :  { %259 = vbcast.lane.b32.xlu1 %v257_v47, 256  ;;  %252 = vbcast.lane.b32.xlu0 %v250_v48, 256 }
  0x4c   :  { %273 = vbcast.lane.b32.xlu1 %v271_v49, 256  ;;  %266 = vbcast.lane.b32.xlu0 %v264_v50, 256 }
  0x50   :  { %287 = vbcast.lane.b32.xlu1 %v285_v51, 256  ;;  %280 = vbcast.lane.b32.xlu0 %v278_v52, 256 }
  0x54   :  { %301 = vbcast.lane.b32.xlu1 %v299_v53, 256  ;;  %294 = vbcast.lane.b32.xlu0 %v292_v54, 256 }
  0x58   :  { %315 = vbcast.lane.b32.xlu1 %v313_v56, 256  ;;  %308 = vbcast.lane.b32.xlu0 %v306_v57, 256 }
  0x5c   :  { %329 = vbcast.lane.b32.xlu1 %v327_v58, 256  ;;  %322 = vbcast.lane.b32.xlu0 %v320_v59, 256 }
  0x60   :  { %343 = vbcast.lane.b32.xlu1 %v341_v60, 256  ;;  %336 = vbcast.lane.b32.xlu0 %v334_v61, 256 }
  0x64   :  { %357 = vbcast.lane.b32.xlu1 %v355_v62, 256  ;;  %350 = vbcast.lane.b32.xlu0 %v348_v63, 256 }
  0x68   :  { %371 = vbcast.lane.b32.xlu1 %v369_v1, 256  ;;  %364 = vbcast.lane.b32.xlu0 %v362_v2, 256 }
  0x6c   :  { %385 = vbcast.lane.b32.xlu1 %v383_v7, 256  ;;  %378 = vbcast.lane.b32.xlu0 %v376_v8, 256 }
  0x70   :  { %399 = vbcast.lane.b32.xlu1 %v397_v9, 256  ;;  %392 = vbcast.lane.b32.xlu0 %v390_v10, 256 }
  0x74   :  { %413 = vbcast.lane.b32.xlu1 %v411_v13, 256  ;;  %406 = vbcast.lane.b32.xlu0 %v404_v14, 256 }
  0x78   :  { %427 = vbcast.lane.b32.xlu1 %v425_v18, 256  ;;  %420 = vbcast.lane.b32.xlu0 %v418_v19, 256 }
  0x7a   :  { %v43_v24 = vpop.permute.xlu1 %42  ;;  %v29_v25 = vpop.permute.xlu0 %28 }
  0x7b   :  { %v477_v26 = vmul.f32 %v1024_v20, %v43_v24  ;;  %v478_v27 = vmul.f32 %v1029_v21, %v43_v24  ;;  %v473_v5 = vmul.f32 %v1024_v20, %v29_v25  ;;  %v474_v3 = vmul.f32 %v1029_v21, %v29_v25 }
  0x7c   :  { %441 = vbcast.lane.b32.xlu1 %v439_v22, 256  ;;  %434 = vbcast.lane.b32.xlu0 %v432_v23, 256 }
  0x7d   :  { %v607_v30 = vadd.f32 %v1036_v4, %v477_v26  ;;  %v608_v31 = vadd.f32 %v1041_v6, %v478_v27  ;;  %v603_v32 = vadd.f32 %v1036_v4, %v473_v5  ;;  %v604_v33 = vadd.f32 %v1041_v6, %v474_v3 }
  0x7e   :  { %v50_v34 = vpop.permute.xlu1 %49  ;;  %v36_v35 = vpop.permute.xlu0 %35 }
  0x7f   :  { %735 = vst [vmem:[#allocation2 + $0x20] sm:$0xff] %v607_v30  ;;  %736 = vst [vmem:[#allocation2 + $0x28] sm:$0xff] %v608_v31  ;;  %v479_v36 = vmul.f32 %v1024_v20, %v50_v34  ;;  %v480_v11 = vmul.f32 %v1029_v21, %v50_v34  ;;  %v475_v12 = vmul.f32 %v1024_v20, %v36_v35 }
  0x80   :  { %731 = vst [vmem:[#allocation2] sm:$0xff] %v603_v32  ;;  %732 = vst [vmem:[#allocation2 + $0x8] sm:$0xff] %v604_v33  ;;  %v476_v37 = vmul.f32 %v1029_v21, %v36_v35  ;;  %455 = vbcast.lane.b32.xlu1 %v453_v28, 256  ;;  %448 = vbcast.lane.b32.xlu0 %v446_v29, 256 }
  0x81   :  { %v609_v40 = vadd.f32 %v1036_v4, %v479_v36  ;;  %v610_v41 = vadd.f32 %v1041_v6, %v480_v11  ;;  %v605_v42 = vadd.f32 %v1036_v4, %v475_v12 }
  0x82   :  { %v606_v43 = vadd.f32 %v1041_v6, %v476_v37  ;;  %v64_v44 = vpop.permute.xlu1 %63  ;;  %v57_v45 = vpop.permute.xlu0 %56 }
  0x83   :  { %737 = vst [vmem:[#allocation2 + $0x30] sm:$0xff] %v609_v40  ;;  %738 = vst [vmem:[#allocation2 + $0x38] sm:$0xff] %v610_v41  ;;  %v483_v46 = vmul.f32 %v1024_v20, %v64_v44  ;;  %v484_v15 = vmul.f32 %v1029_v21, %v64_v44  ;;  %v481_v16 = vmul.f32 %v1024_v20, %v57_v45 }
  0x84   :  { %733 = vst [vmem:[#allocation2 + $0x10] sm:$0xff] %v605_v42  ;;  %734 = vst [vmem:[#allocation2 + $0x18] sm:$0xff] %v606_v43  ;;  %v482_v47 = vmul.f32 %v1029_v21, %v57_v45  ;;  %469 = vbcast.lane.b32.xlu1 %v467_v38, 256  ;;  %462 = vbcast.lane.b32.xlu0 %v460_v39, 256 }
  0x85   :  { %v613_v48 = vadd.f32 %v1036_v4, %v483_v46  ;;  %v614_v49 = vadd.f32 %v1041_v6, %v484_v15  ;;  %v611_v50 = vadd.f32 %v1036_v4, %v481_v16 }
  0x86   :  { %v612_v51 = vadd.f32 %v1041_v6, %v482_v47  ;;  %v78_v52 = vpop.permute.xlu1 %77  ;;  %v71_v53 = vpop.permute.xlu0 %70 }
  0x87   :  { %741 = vst [vmem:[#allocation2 + $0x50] sm:$0xff] %v613_v48  ;;  %742 = vst [vmem:[#allocation2 + $0x58] sm:$0xff] %v614_v49  ;;  %v487_v54 = vmul.f32 %v1024_v20, %v78_v52  ;;  %v488_v55 = vmul.f32 %v1029_v21, %v78_v52  ;;  %v485_v56 = vmul.f32 %v1024_v20, %v71_v53 }
  0x88   :  { %739 = vst [vmem:[#allocation2 + $0x40] sm:$0xff] %v611_v50  ;;  %740 = vst [vmem:[#allocation2 + $0x48] sm:$0xff] %v612_v51  ;;  %v486_v57 = vmul.f32 %v1029_v21, %v71_v53 }
  0x89   :  { %v617_v58 = vadd.f32 %v1036_v4, %v487_v54  ;;  %v618_v59 = vadd.f32 %v1041_v6, %v488_v55  ;;  %v615_v60 = vadd.f32 %v1036_v4, %v485_v56 }
  0x8a   :  { %v616_v61 = vadd.f32 %v1041_v6, %v486_v57  ;;  %v92_v62 = vpop.permute.xlu1 %91  ;;  %v85_v63 = vpop.permute.xlu0 %84 }
  0x8b   :  { %745 = vst [vmem:[#allocation2 + $0x70] sm:$0xff] %v617_v58  ;;  %746 = vst [vmem:[#allocation2 + $0x78] sm:$0xff] %v618_v59  ;;  %v491_v0 = vmul.f32 %v1024_v20, %v92_v62  ;;  %v492_v1 = vmul.f32 %v1029_v21, %v92_v62  ;;  %v489_v2 = vmul.f32 %v1024_v20, %v85_v63 }
  0x8c   :  { %743 = vst [vmem:[#allocation2 + $0x60] sm:$0xff] %v615_v60  ;;  %744 = vst [vmem:[#allocation2 + $0x68] sm:$0xff] %v616_v61  ;;  %v490_v7 = vmul.f32 %v1029_v21, %v85_v63 }
  0x8d   :  { %v621_v8 = vadd.f32 %v1036_v4, %v491_v0  ;;  %v622_v9 = vadd.f32 %v1041_v6, %v492_v1  ;;  %v619_v10 = vadd.f32 %v1036_v4, %v489_v2 }
  0x8e   :  { %v620_v13 = vadd.f32 %v1041_v6, %v490_v7  ;;  %v106_v14 = vpop.permute.xlu1 %105  ;;  %v99_v17 = vpop.permute.xlu0 %98 }
  0x8f   :  { %749 = vst [vmem:[#allocation2 + $0x90] sm:$0xff] %v621_v8  ;;  %750 = vst [vmem:[#allocation2 + $0x98] sm:$0xff] %v622_v9  ;;  %v495_v18 = vmul.f32 %v1024_v20, %v106_v14  ;;  %v496_v19 = vmul.f32 %v1029_v21, %v106_v14  ;;  %v493_v22 = vmul.f32 %v1024_v20, %v99_v17 }
  0x90   :  { %747 = vst [vmem:[#allocation2 + $0x80] sm:$0xff] %v619_v10  ;;  %748 = vst [vmem:[#allocation2 + $0x88] sm:$0xff] %v620_v13  ;;  %v494_v23 = vmul.f32 %v1029_v21, %v99_v17 }
  0x91   :  { %v625_v24 = vadd.f32 %v1036_v4, %v495_v18  ;;  %v626_v25 = vadd.f32 %v1041_v6, %v496_v19  ;;  %v623_v26 = vadd.f32 %v1036_v4, %v493_v22 }
  0x92   :  { %v624_v27 = vadd.f32 %v1041_v6, %v494_v23  ;;  %v120_v5 = vpop.permute.xlu1 %119  ;;  %v113_v3 = vpop.permute.xlu0 %112 }
  0x93   :  { %753 = vst [vmem:[#allocation2 + $0xb0] sm:$0xff] %v625_v24  ;;  %754 = vst [vmem:[#allocation2 + $0xb8] sm:$0xff] %v626_v25  ;;  %v499_v28 = vmul.f32 %v1024_v20, %v120_v5  ;;  %v500_v29 = vmul.f32 %v1029_v21, %v120_v5  ;;  %v497_v30 = vmul.f32 %v1024_v20, %v113_v3 }
  0x94   :  { %751 = vst [vmem:[#allocation2 + $0xa0] sm:$0xff] %v623_v26  ;;  %752 = vst [vmem:[#allocation2 + $0xa8] sm:$0xff] %v624_v27  ;;  %v498_v31 = vmul.f32 %v1029_v21, %v113_v3 }
  0x95   :  { %v629_v32 = vadd.f32 %v1036_v4, %v499_v28  ;;  %v630_v33 = vadd.f32 %v1041_v6, %v500_v29  ;;  %v627_v34 = vadd.f32 %v1036_v4, %v497_v30 }
  0x96   :  { %v628_v35 = vadd.f32 %v1041_v6, %v498_v31  ;;  %v134_v36 = vpop.permute.xlu1 %133  ;;  %v127_v11 = vpop.permute.xlu0 %126 }
  0x97   :  { %757 = vst [vmem:[#allocation2 + $0xd0] sm:$0xff] %v629_v32  ;;  %758 = vst [vmem:[#allocation2 + $0xd8] sm:$0xff] %v630_v33  ;;  %v503_v12 = vmul.f32 %v1024_v20, %v134_v36  ;;  %v504_v37 = vmul.f32 %v1029_v21, %v134_v36  ;;  %v501_v38 = vmul.f32 %v1024_v20, %v127_v11 }
  0x98   :  { %755 = vst [vmem:[#allocation2 + $0xc0] sm:$0xff] %v627_v34  ;;  %756 = vst [vmem:[#allocation2 + $0xc8] sm:$0xff] %v628_v35  ;;  %v502_v39 = vmul.f32 %v1029_v21, %v127_v11 }
  0x99   :  { %v633_v40 = vadd.f32 %v1036_v4, %v503_v12  ;;  %v634_v41 = vadd.f32 %v1041_v6, %v504_v37  ;;  %v631_v42 = vadd.f32 %v1036_v4, %v501_v38 }
  0x9a   :  { %v632_v43 = vadd.f32 %v1041_v6, %v502_v39  ;;  %v148_v44 = vpop.permute.xlu1 %147  ;;  %v141_v45 = vpop.permute.xlu0 %140 }
  0x9b   :  { %761 = vst [vmem:[#allocation2 + $0xf0] sm:$0xff] %v633_v40  ;;  %762 = vst [vmem:[#allocation2 + $0xf8] sm:$0xff] %v634_v41  ;;  %v507_v46 = vmul.f32 %v1024_v20, %v148_v44  ;;  %v508_v15 = vmul.f32 %v1029_v21, %v148_v44  ;;  %v505_v16 = vmul.f32 %v1024_v20, %v141_v45 }
  0x9c   :  { %759 = vst [vmem:[#allocation2 + $0xe0] sm:$0xff] %v631_v42  ;;  %760 = vst [vmem:[#allocation2 + $0xe8] sm:$0xff] %v632_v43  ;;  %v506_v47 = vmul.f32 %v1029_v21, %v141_v45 }
  0x9d   :  { %v637_v48 = vadd.f32 %v1036_v4, %v507_v46  ;;  %v638_v49 = vadd.f32 %v1041_v6, %v508_v15  ;;  %v635_v50 = vadd.f32 %v1036_v4, %v505_v16 }
  0x9e   :  { %v636_v51 = vadd.f32 %v1041_v6, %v506_v47  ;;  %v162_v52 = vpop.permute.xlu1 %161  ;;  %v155_v53 = vpop.permute.xlu0 %154 }
  0x9f   :  { %765 = vst [vmem:[#allocation2 + $0x110] sm:$0xff] %v637_v48  ;;  %766 = vst [vmem:[#allocation2 + $0x118] sm:$0xff] %v638_v49  ;;  %v511_v54 = vmul.f32 %v1024_v20, %v162_v52  ;;  %v512_v55 = vmul.f32 %v1029_v21, %v162_v52  ;;  %v509_v56 = vmul.f32 %v1024_v20, %v155_v53 }
  0xa0   :  { %763 = vst [vmem:[#allocation2 + $0x100] sm:$0xff] %v635_v50  ;;  %764 = vst [vmem:[#allocation2 + $0x108] sm:$0xff] %v636_v51  ;;  %v510_v57 = vmul.f32 %v1029_v21, %v155_v53 }
  0xa1   :  { %v641_v58 = vadd.f32 %v1036_v4, %v511_v54  ;;  %v642_v59 = vadd.f32 %v1041_v6, %v512_v55  ;;  %v639_v60 = vadd.f32 %v1036_v4, %v509_v56 }
  0xa2   :  { %v640_v61 = vadd.f32 %v1041_v6, %v510_v57  ;;  %v176_v62 = vpop.permute.xlu1 %175  ;;  %v169_v63 = vpop.permute.xlu0 %168 }
  0xa3   :  { %769 = vst [vmem:[#allocation2 + $0x130] sm:$0xff] %v641_v58  ;;  %770 = vst [vmem:[#allocation2 + $0x138] sm:$0xff] %v642_v59  ;;  %v515_v0 = vmul.f32 %v1024_v20, %v176_v62  ;;  %v516_v1 = vmul.f32 %v1029_v21, %v176_v62  ;;  %v513_v2 = vmul.f32 %v1024_v20, %v169_v63 }
  0xa4   :  { %767 = vst [vmem:[#allocation2 + $0x120] sm:$0xff] %v639_v60  ;;  %768 = vst [vmem:[#allocation2 + $0x128] sm:$0xff] %v640_v61  ;;  %v514_v7 = vmul.f32 %v1029_v21, %v169_v63 }
  0xa5   :  { %v645_v8 = vadd.f32 %v1036_v4, %v515_v0  ;;  %v646_v9 = vadd.f32 %v1041_v6, %v516_v1  ;;  %v643_v10 = vadd.f32 %v1036_v4, %v513_v2 }
  0xa6   :  { %v644_v13 = vadd.f32 %v1041_v6, %v514_v7  ;;  %v190_v14 = vpop.permute.xlu1 %189  ;;  %v183_v17 = vpop.permute.xlu0 %182 }
  0xa7   :  { %773 = vst [vmem:[#allocation2 + $0x150] sm:$0xff] %v645_v8  ;;  %774 = vst [vmem:[#allocation2 + $0x158] sm:$0xff] %v646_v9  ;;  %v519_v18 = vmul.f32 %v1024_v20, %v190_v14  ;;  %v520_v19 = vmul.f32 %v1029_v21, %v190_v14  ;;  %v517_v22 = vmul.f32 %v1024_v20, %v183_v17 }
  0xa8   :  { %771 = vst [vmem:[#allocation2 + $0x140] sm:$0xff] %v643_v10  ;;  %772 = vst [vmem:[#allocation2 + $0x148] sm:$0xff] %v644_v13  ;;  %v518_v23 = vmul.f32 %v1029_v21, %v183_v17 }
  0xa9   :  { %v649_v24 = vadd.f32 %v1036_v4, %v519_v18  ;;  %v650_v25 = vadd.f32 %v1041_v6, %v520_v19  ;;  %v647_v26 = vadd.f32 %v1036_v4, %v517_v22 }
  0xaa   :  { %v648_v27 = vadd.f32 %v1041_v6, %v518_v23  ;;  %v204_v5 = vpop.permute.xlu1 %203  ;;  %v197_v3 = vpop.permute.xlu0 %196 }
  0xab   :  { %777 = vst [vmem:[#allocation2 + $0x170] sm:$0xff] %v649_v24  ;;  %778 = vst [vmem:[#allocation2 + $0x178] sm:$0xff] %v650_v25  ;;  %v523_v28 = vmul.f32 %v1024_v20, %v204_v5  ;;  %v524_v29 = vmul.f32 %v1029_v21, %v204_v5  ;;  %v521_v30 = vmul.f32 %v1024_v20, %v197_v3 }
  0xac   :  { %775 = vst [vmem:[#allocation2 + $0x160] sm:$0xff] %v647_v26  ;;  %776 = vst [vmem:[#allocation2 + $0x168] sm:$0xff] %v648_v27  ;;  %v522_v31 = vmul.f32 %v1029_v21, %v197_v3 }
  0xad   :  { %v653_v32 = vadd.f32 %v1036_v4, %v523_v28  ;;  %v654_v33 = vadd.f32 %v1041_v6, %v524_v29  ;;  %v651_v34 = vadd.f32 %v1036_v4, %v521_v30 }
  0xae   :  { %v652_v35 = vadd.f32 %v1041_v6, %v522_v31  ;;  %v218_v36 = vpop.permute.xlu1 %217  ;;  %v211_v11 = vpop.permute.xlu0 %210 }
  0xaf   :  { %781 = vst [vmem:[#allocation2 + $0x190] sm:$0xff] %v653_v32  ;;  %782 = vst [vmem:[#allocation2 + $0x198] sm:$0xff] %v654_v33  ;;  %v527_v12 = vmul.f32 %v1024_v20, %v218_v36  ;;  %v528_v37 = vmul.f32 %v1029_v21, %v218_v36  ;;  %v525_v38 = vmul.f32 %v1024_v20, %v211_v11 }
  0xb0   :  { %779 = vst [vmem:[#allocation2 + $0x180] sm:$0xff] %v651_v34  ;;  %780 = vst [vmem:[#allocation2 + $0x188] sm:$0xff] %v652_v35  ;;  %v526_v39 = vmul.f32 %v1029_v21, %v211_v11 }
  0xb1   :  { %v657_v40 = vadd.f32 %v1036_v4, %v527_v12  ;;  %v658_v41 = vadd.f32 %v1041_v6, %v528_v37  ;;  %v655_v42 = vadd.f32 %v1036_v4, %v525_v38 }
  0xb2   :  { %v656_v43 = vadd.f32 %v1041_v6, %v526_v39  ;;  %v232_v44 = vpop.permute.xlu1 %231  ;;  %v225_v45 = vpop.permute.xlu0 %224 }
  0xb3   :  { %785 = vst [vmem:[#allocation2 + $0x1b0] sm:$0xff] %v657_v40  ;;  %786 = vst [vmem:[#allocation2 + $0x1b8] sm:$0xff] %v658_v41  ;;  %v531_v46 = vmul.f32 %v1024_v20, %v232_v44  ;;  %v532_v15 = vmul.f32 %v1029_v21, %v232_v44  ;;  %v529_v16 = vmul.f32 %v1024_v20, %v225_v45 }
  0xb4   :  { %783 = vst [vmem:[#allocation2 + $0x1a0] sm:$0xff] %v655_v42  ;;  %784 = vst [vmem:[#allocation2 + $0x1a8] sm:$0xff] %v656_v43  ;;  %v530_v47 = vmul.f32 %v1029_v21, %v225_v45 }
  0xb5   :  { %v661_v48 = vadd.f32 %v1036_v4, %v531_v46  ;;  %v662_v49 = vadd.f32 %v1041_v6, %v532_v15  ;;  %v659_v50 = vadd.f32 %v1036_v4, %v529_v16 }
  0xb6   :  { %v660_v51 = vadd.f32 %v1041_v6, %v530_v47  ;;  %v246_v52 = vpop.permute.xlu1 %245  ;;  %v239_v53 = vpop.permute.xlu0 %238 }
  0xb7   :  { %789 = vst [vmem:[#allocation2 + $0x1d0] sm:$0xff] %v661_v48  ;;  %790 = vst [vmem:[#allocation2 + $0x1d8] sm:$0xff] %v662_v49  ;;  %v535_v54 = vmul.f32 %v1024_v20, %v246_v52  ;;  %v536_v55 = vmul.f32 %v1029_v21, %v246_v52  ;;  %v533_v56 = vmul.f32 %v1024_v20, %v239_v53 }
  0xb8   :  { %787 = vst [vmem:[#allocation2 + $0x1c0] sm:$0xff] %v659_v50  ;;  %788 = vst [vmem:[#allocation2 + $0x1c8] sm:$0xff] %v660_v51  ;;  %v534_v57 = vmul.f32 %v1029_v21, %v239_v53 }
  0xb9   :  { %v665_v58 = vadd.f32 %v1036_v4, %v535_v54  ;;  %v666_v59 = vadd.f32 %v1041_v6, %v536_v55  ;;  %v663_v60 = vadd.f32 %v1036_v4, %v533_v56 }
  0xba   :  { %v664_v61 = vadd.f32 %v1041_v6, %v534_v57  ;;  %v260_v62 = vpop.permute.xlu1 %259  ;;  %v253_v63 = vpop.permute.xlu0 %252 }
  0xbb   :  { %793 = vst [vmem:[#allocation2 + $0x1f0] sm:$0xff] %v665_v58  ;;  %794 = vst [vmem:[#allocation2 + $0x1f8] sm:$0xff] %v666_v59  ;;  %v539_v0 = vmul.f32 %v1024_v20, %v260_v62  ;;  %v540_v1 = vmul.f32 %v1029_v21, %v260_v62  ;;  %v537_v2 = vmul.f32 %v1024_v20, %v253_v63 }
  0xbc   :  { %791 = vst [vmem:[#allocation2 + $0x1e0] sm:$0xff] %v663_v60  ;;  %792 = vst [vmem:[#allocation2 + $0x1e8] sm:$0xff] %v664_v61  ;;  %v538_v7 = vmul.f32 %v1029_v21, %v253_v63 }
  0xbd   :  { %v669_v8 = vadd.f32 %v1036_v4, %v539_v0  ;;  %v670_v9 = vadd.f32 %v1041_v6, %v540_v1  ;;  %v667_v10 = vadd.f32 %v1036_v4, %v537_v2 }
  0xbe   :  { %v668_v13 = vadd.f32 %v1041_v6, %v538_v7  ;;  %v274_v14 = vpop.permute.xlu1 %273  ;;  %v267_v17 = vpop.permute.xlu0 %266 }
  0xbf   :  { %797 = vst [vmem:[#allocation2 + $0x210] sm:$0xff] %v669_v8  ;;  %798 = vst [vmem:[#allocation2 + $0x218] sm:$0xff] %v670_v9  ;;  %v543_v18 = vmul.f32 %v1024_v20, %v274_v14  ;;  %v544_v19 = vmul.f32 %v1029_v21, %v274_v14  ;;  %v541_v22 = vmul.f32 %v1024_v20, %v267_v17 }
  0xc0   :  { %795 = vst [vmem:[#allocation2 + $0x200] sm:$0xff] %v667_v10  ;;  %796 = vst [vmem:[#allocation2 + $0x208] sm:$0xff] %v668_v13  ;;  %v542_v23 = vmul.f32 %v1029_v21, %v267_v17 }
  0xc1   :  { %v673_v24 = vadd.f32 %v1036_v4, %v543_v18  ;;  %v674_v25 = vadd.f32 %v1041_v6, %v544_v19  ;;  %v671_v26 = vadd.f32 %v1036_v4, %v541_v22 }
  0xc2   :  { %v672_v27 = vadd.f32 %v1041_v6, %v542_v23  ;;  %v288_v5 = vpop.permute.xlu1 %287  ;;  %v281_v3 = vpop.permute.xlu0 %280 }
  0xc3   :  { %801 = vst [vmem:[#allocation2 + $0x230] sm:$0xff] %v673_v24  ;;  %802 = vst [vmem:[#allocation2 + $0x238] sm:$0xff] %v674_v25  ;;  %v547_v28 = vmul.f32 %v1024_v20, %v288_v5  ;;  %v548_v29 = vmul.f32 %v1029_v21, %v288_v5  ;;  %v545_v30 = vmul.f32 %v1024_v20, %v281_v3 }
  0xc4   :  { %799 = vst [vmem:[#allocation2 + $0x220] sm:$0xff] %v671_v26  ;;  %800 = vst [vmem:[#allocation2 + $0x228] sm:$0xff] %v672_v27  ;;  %v546_v31 = vmul.f32 %v1029_v21, %v281_v3 }
  0xc5   :  { %v677_v32 = vadd.f32 %v1036_v4, %v547_v28  ;;  %v678_v33 = vadd.f32 %v1041_v6, %v548_v29  ;;  %v675_v34 = vadd.f32 %v1036_v4, %v545_v30 }
  0xc6   :  { %v676_v35 = vadd.f32 %v1041_v6, %v546_v31  ;;  %v302_v36 = vpop.permute.xlu1 %301  ;;  %v295_v11 = vpop.permute.xlu0 %294 }
  0xc7   :  { %805 = vst [vmem:[#allocation2 + $0x250] sm:$0xff] %v677_v32  ;;  %806 = vst [vmem:[#allocation2 + $0x258] sm:$0xff] %v678_v33  ;;  %v551_v12 = vmul.f32 %v1024_v20, %v302_v36  ;;  %v552_v37 = vmul.f32 %v1029_v21, %v302_v36  ;;  %v549_v38 = vmul.f32 %v1024_v20, %v295_v11 }
  0xc8   :  { %803 = vst [vmem:[#allocation2 + $0x240] sm:$0xff] %v675_v34  ;;  %804 = vst [vmem:[#allocation2 + $0x248] sm:$0xff] %v676_v35  ;;  %v550_v39 = vmul.f32 %v1029_v21, %v295_v11 }
  0xc9   :  { %v681_v40 = vadd.f32 %v1036_v4, %v551_v12  ;;  %v682_v41 = vadd.f32 %v1041_v6, %v552_v37  ;;  %v679_v42 = vadd.f32 %v1036_v4, %v549_v38 }
  0xca   :  { %v680_v43 = vadd.f32 %v1041_v6, %v550_v39  ;;  %v316_v44 = vpop.permute.xlu1 %315  ;;  %v309_v45 = vpop.permute.xlu0 %308 }
  0xcb   :  { %809 = vst [vmem:[#allocation2 + $0x270] sm:$0xff] %v681_v40  ;;  %810 = vst [vmem:[#allocation2 + $0x278] sm:$0xff] %v682_v41  ;;  %v555_v46 = vmul.f32 %v1024_v20, %v316_v44  ;;  %v556_v15 = vmul.f32 %v1029_v21, %v316_v44  ;;  %v553_v16 = vmul.f32 %v1024_v20, %v309_v45 }
  0xcc   :  { %807 = vst [vmem:[#allocation2 + $0x260] sm:$0xff] %v679_v42  ;;  %808 = vst [vmem:[#allocation2 + $0x268] sm:$0xff] %v680_v43  ;;  %v554_v47 = vmul.f32 %v1029_v21, %v309_v45 }
  0xcd   :  { %v685_v48 = vadd.f32 %v1036_v4, %v555_v46  ;;  %v686_v49 = vadd.f32 %v1041_v6, %v556_v15  ;;  %v683_v50 = vadd.f32 %v1036_v4, %v553_v16 }
  0xce   :  { %v684_v51 = vadd.f32 %v1041_v6, %v554_v47  ;;  %v330_v52 = vpop.permute.xlu1 %329  ;;  %v323_v53 = vpop.permute.xlu0 %322 }
  0xcf   :  { %813 = vst [vmem:[#allocation2 + $0x290] sm:$0xff] %v685_v48  ;;  %814 = vst [vmem:[#allocation2 + $0x298] sm:$0xff] %v686_v49  ;;  %v559_v54 = vmul.f32 %v1024_v20, %v330_v52  ;;  %v560_v55 = vmul.f32 %v1029_v21, %v330_v52  ;;  %v557_v56 = vmul.f32 %v1024_v20, %v323_v53 }
  0xd0   :  { %811 = vst [vmem:[#allocation2 + $0x280] sm:$0xff] %v683_v50  ;;  %812 = vst [vmem:[#allocation2 + $0x288] sm:$0xff] %v684_v51  ;;  %v558_v57 = vmul.f32 %v1029_v21, %v323_v53 }
  0xd1   :  { %v689_v58 = vadd.f32 %v1036_v4, %v559_v54  ;;  %v690_v59 = vadd.f32 %v1041_v6, %v560_v55  ;;  %v687_v60 = vadd.f32 %v1036_v4, %v557_v56 }
  0xd2   :  { %v688_v61 = vadd.f32 %v1041_v6, %v558_v57  ;;  %v344_v62 = vpop.permute.xlu1 %343  ;;  %v337_v63 = vpop.permute.xlu0 %336 }
  0xd3   :  { %817 = vst [vmem:[#allocation2 + $0x2b0] sm:$0xff] %v689_v58  ;;  %818 = vst [vmem:[#allocation2 + $0x2b8] sm:$0xff] %v690_v59  ;;  %v563_v0 = vmul.f32 %v1024_v20, %v344_v62  ;;  %v564_v1 = vmul.f32 %v1029_v21, %v344_v62  ;;  %v561_v2 = vmul.f32 %v1024_v20, %v337_v63 }
  0xd4   :  { %815 = vst [vmem:[#allocation2 + $0x2a0] sm:$0xff] %v687_v60  ;;  %816 = vst [vmem:[#allocation2 + $0x2a8] sm:$0xff] %v688_v61  ;;  %v562_v7 = vmul.f32 %v1029_v21, %v337_v63 }
  0xd5   :  { %v693_v8 = vadd.f32 %v1036_v4, %v563_v0  ;;  %v694_v9 = vadd.f32 %v1041_v6, %v564_v1  ;;  %v691_v10 = vadd.f32 %v1036_v4, %v561_v2 }
  0xd6   :  { %v692_v13 = vadd.f32 %v1041_v6, %v562_v7  ;;  %v358_v14 = vpop.permute.xlu1 %357  ;;  %v351_v17 = vpop.permute.xlu0 %350 }
  0xd7   :  { %821 = vst [vmem:[#allocation2 + $0x2d0] sm:$0xff] %v693_v8  ;;  %822 = vst [vmem:[#allocation2 + $0x2d8] sm:$0xff] %v694_v9  ;;  %v567_v18 = vmul.f32 %v1024_v20, %v358_v14  ;;  %v568_v19 = vmul.f32 %v1029_v21, %v358_v14  ;;  %v565_v22 = vmul.f32 %v1024_v20, %v351_v17 }
  0xd8   :  { %819 = vst [vmem:[#allocation2 + $0x2c0] sm:$0xff] %v691_v10  ;;  %820 = vst [vmem:[#allocation2 + $0x2c8] sm:$0xff] %v692_v13  ;;  %v566_v23 = vmul.f32 %v1029_v21, %v351_v17 }
  0xd9   :  { %v697_v24 = vadd.f32 %v1036_v4, %v567_v18  ;;  %v698_v25 = vadd.f32 %v1041_v6, %v568_v19  ;;  %v695_v26 = vadd.f32 %v1036_v4, %v565_v22 }
  0xda   :  { %v696_v27 = vadd.f32 %v1041_v6, %v566_v23  ;;  %v372_v5 = vpop.permute.xlu1 %371  ;;  %v365_v3 = vpop.permute.xlu0 %364 }
  0xdb   :  { %825 = vst [vmem:[#allocation2 + $0x2f0] sm:$0xff] %v697_v24  ;;  %826 = vst [vmem:[#allocation2 + $0x2f8] sm:$0xff] %v698_v25  ;;  %v571_v28 = vmul.f32 %v1024_v20, %v372_v5  ;;  %v572_v29 = vmul.f32 %v1029_v21, %v372_v5  ;;  %v569_v30 = vmul.f32 %v1024_v20, %v365_v3 }
  0xdc   :  { %823 = vst [vmem:[#allocation2 + $0x2e0] sm:$0xff] %v695_v26  ;;  %824 = vst [vmem:[#allocation2 + $0x2e8] sm:$0xff] %v696_v27  ;;  %v570_v31 = vmul.f32 %v1029_v21, %v365_v3 }
  0xdd   :  { %v701_v32 = vadd.f32 %v1036_v4, %v571_v28  ;;  %v702_v33 = vadd.f32 %v1041_v6, %v572_v29  ;;  %v699_v34 = vadd.f32 %v1036_v4, %v569_v30 }
  0xde   :  { %v700_v35 = vadd.f32 %v1041_v6, %v570_v31  ;;  %v386_v36 = vpop.permute.xlu1 %385  ;;  %v379_v11 = vpop.permute.xlu0 %378 }
  0xdf   :  { %829 = vst [vmem:[#allocation2 + $0x310] sm:$0xff] %v701_v32  ;;  %830 = vst [vmem:[#allocation2 + $0x318] sm:$0xff] %v702_v33  ;;  %v575_v12 = vmul.f32 %v1024_v20, %v386_v36  ;;  %v576_v37 = vmul.f32 %v1029_v21, %v386_v36  ;;  %v573_v38 = vmul.f32 %v1024_v20, %v379_v11 }
  0xe0   :  { %827 = vst [vmem:[#allocation2 + $0x300] sm:$0xff] %v699_v34  ;;  %828 = vst [vmem:[#allocation2 + $0x308] sm:$0xff] %v700_v35  ;;  %v574_v39 = vmul.f32 %v1029_v21, %v379_v11 }
  0xe1   :  { %v705_v40 = vadd.f32 %v1036_v4, %v575_v12  ;;  %v706_v41 = vadd.f32 %v1041_v6, %v576_v37  ;;  %v703_v42 = vadd.f32 %v1036_v4, %v573_v38 }
  0xe2   :  { %v704_v43 = vadd.f32 %v1041_v6, %v574_v39  ;;  %v400_v44 = vpop.permute.xlu1 %399  ;;  %v393_v45 = vpop.permute.xlu0 %392 }
  0xe3   :  { %833 = vst [vmem:[#allocation2 + $0x330] sm:$0xff] %v705_v40  ;;  %834 = vst [vmem:[#allocation2 + $0x338] sm:$0xff] %v706_v41  ;;  %v579_v46 = vmul.f32 %v1024_v20, %v400_v44  ;;  %v580_v15 = vmul.f32 %v1029_v21, %v400_v44  ;;  %v577_v16 = vmul.f32 %v1024_v20, %v393_v45 }
  0xe4   :  { %831 = vst [vmem:[#allocation2 + $0x320] sm:$0xff] %v703_v42  ;;  %832 = vst [vmem:[#allocation2 + $0x328] sm:$0xff] %v704_v43  ;;  %v578_v47 = vmul.f32 %v1029_v21, %v393_v45 }
  0xe5   :  { %v709_v48 = vadd.f32 %v1036_v4, %v579_v46  ;;  %v710_v49 = vadd.f32 %v1041_v6, %v580_v15  ;;  %v707_v50 = vadd.f32 %v1036_v4, %v577_v16 }
  0xe6   :  { %v708_v51 = vadd.f32 %v1041_v6, %v578_v47  ;;  %v414_v52 = vpop.permute.xlu1 %413  ;;  %v407_v53 = vpop.permute.xlu0 %406 }
  0xe7   :  { %837 = vst [vmem:[#allocation2 + $0x350] sm:$0xff] %v709_v48  ;;  %838 = vst [vmem:[#allocation2 + $0x358] sm:$0xff] %v710_v49  ;;  %v583_v54 = vmul.f32 %v1024_v20, %v414_v52  ;;  %v584_v55 = vmul.f32 %v1029_v21, %v414_v52  ;;  %v581_v56 = vmul.f32 %v1024_v20, %v407_v53 }
  0xe8   :  { %835 = vst [vmem:[#allocation2 + $0x340] sm:$0xff] %v707_v50  ;;  %836 = vst [vmem:[#allocation2 + $0x348] sm:$0xff] %v708_v51  ;;  %v582_v57 = vmul.f32 %v1029_v21, %v407_v53 }
  0xe9   :  { %v713_v58 = vadd.f32 %v1036_v4, %v583_v54  ;;  %v714_v59 = vadd.f32 %v1041_v6, %v584_v55  ;;  %v711_v60 = vadd.f32 %v1036_v4, %v581_v56 }
  0xea   :  { %v712_v61 = vadd.f32 %v1041_v6, %v582_v57  ;;  %v428_v62 = vpop.permute.xlu1 %427  ;;  %v421_v63 = vpop.permute.xlu0 %420 }
  0xeb   :  { %841 = vst [vmem:[#allocation2 + $0x370] sm:$0xff] %v713_v58  ;;  %842 = vst [vmem:[#allocation2 + $0x378] sm:$0xff] %v714_v59  ;;  %v587_v0 = vmul.f32 %v1024_v20, %v428_v62  ;;  %v588_v1 = vmul.f32 %v1029_v21, %v428_v62  ;;  %v585_v2 = vmul.f32 %v1024_v20, %v421_v63 }
  0xec   :  { %839 = vst [vmem:[#allocation2 + $0x360] sm:$0xff] %v711_v60  ;;  %840 = vst [vmem:[#allocation2 + $0x368] sm:$0xff] %v712_v61  ;;  %v586_v7 = vmul.f32 %v1029_v21, %v421_v63 }
  0xed   :  { %v717_v8 = vadd.f32 %v1036_v4, %v587_v0  ;;  %v718_v9 = vadd.f32 %v1041_v6, %v588_v1  ;;  %v715_v10 = vadd.f32 %v1036_v4, %v585_v2 }
  0xee   :  { %v716_v13 = vadd.f32 %v1041_v6, %v586_v7  ;;  %v442_v14 = vpop.permute.xlu1 %441  ;;  %v435_v17 = vpop.permute.xlu0 %434 }
  0xef   :  { %845 = vst [vmem:[#allocation2 + $0x390] sm:$0xff] %v717_v8  ;;  %846 = vst [vmem:[#allocation2 + $0x398] sm:$0xff] %v718_v9  ;;  %v591_v18 = vmul.f32 %v1024_v20, %v442_v14  ;;  %v592_v19 = vmul.f32 %v1029_v21, %v442_v14  ;;  %v589_v22 = vmul.f32 %v1024_v20, %v435_v17 }
  0xf0   :  { %843 = vst [vmem:[#allocation2 + $0x380] sm:$0xff] %v715_v10  ;;  %844 = vst [vmem:[#allocation2 + $0x388] sm:$0xff] %v716_v13  ;;  %v590_v23 = vmul.f32 %v1029_v21, %v435_v17 }
  0xf1   :  { %v721_v24 = vadd.f32 %v1036_v4, %v591_v18  ;;  %v722_v25 = vadd.f32 %v1041_v6, %v592_v19  ;;  %v719_v26 = vadd.f32 %v1036_v4, %v589_v22 }
  0xf2   :  { %v720_v27 = vadd.f32 %v1041_v6, %v590_v23  ;;  %v456_v5 = vpop.permute.xlu1 %455  ;;  %v449_v3 = vpop.permute.xlu0 %448 }
  0xf3   :  { %849 = vst [vmem:[#allocation2 + $0x3b0] sm:$0xff] %v721_v24  ;;  %850 = vst [vmem:[#allocation2 + $0x3b8] sm:$0xff] %v722_v25  ;;  %v595_v28 = vmul.f32 %v1024_v20, %v456_v5  ;;  %v596_v29 = vmul.f32 %v1029_v21, %v456_v5  ;;  %v593_v30 = vmul.f32 %v1024_v20, %v449_v3 }
  0xf4   :  { %847 = vst [vmem:[#allocation2 + $0x3a0] sm:$0xff] %v719_v26  ;;  %848 = vst [vmem:[#allocation2 + $0x3a8] sm:$0xff] %v720_v27  ;;  %v594_v31 = vmul.f32 %v1029_v21, %v449_v3 }
  0xf5   :  { %v725_v32 = vadd.f32 %v1036_v4, %v595_v28  ;;  %v726_v33 = vadd.f32 %v1041_v6, %v596_v29  ;;  %v723_v34 = vadd.f32 %v1036_v4, %v593_v30 }
  0xf6   :  { %v724_v35 = vadd.f32 %v1041_v6, %v594_v31  ;;  %v470_v36 = vpop.permute.xlu1 %469  ;;  %v463_v11 = vpop.permute.xlu0 %462 }
  0xf7   :  { %853 = vst [vmem:[#allocation2 + $0x3d0] sm:$0xff] %v725_v32  ;;  %854 = vst [vmem:[#allocation2 + $0x3d8] sm:$0xff] %v726_v33  ;;  %v599_v12 = vmul.f32 %v1024_v20, %v470_v36  ;;  %v600_v37 = vmul.f32 %v1029_v21, %v470_v36  ;;  %v597_v38 = vmul.f32 %v1024_v20, %v463_v11 }
  0xf8   :  { %851 = vst [vmem:[#allocation2 + $0x3c0] sm:$0xff] %v723_v34  ;;  %852 = vst [vmem:[#allocation2 + $0x3c8] sm:$0xff] %v724_v35  ;;  %v598_v39 = vmul.f32 %v1029_v21, %v463_v11 }
  0xf9   :  { %v729_v40 = vadd.f32 %v1036_v4, %v599_v12  ;;  %v730_v41 = vadd.f32 %v1041_v6, %v600_v37  ;;  %v727_v42 = vadd.f32 %v1036_v4, %v597_v38 }
  0xfa   :  { %v728_v43 = vadd.f32 %v1041_v6, %v598_v39 }
  0xfb   :  { %857 = vst [vmem:[#allocation2 + $0x3f0] sm:$0xff] %v729_v40  ;;  %858 = vst [vmem:[#allocation2 + $0x3f8] sm:$0xff] %v730_v41 }
  0xfc   :  { %855 = vst [vmem:[#allocation2 + $0x3e0] sm:$0xff] %v727_v42  ;;  %856 = vst [vmem:[#allocation2 + $0x3e8] sm:$0xff] %v728_v43 }
  0xfd   :  { %889 = shalt.err (!%p886_p4)
}
  0xfe   :  { %s901_s9 = smov 256   ;;  %s902_s10 = smov 16  }
  0xff   :  { %870 = dma.vmem_to_hbm [thread:$0]  %s865_s2, 16384, %s1309_s3, [#allocation3], %s901_s9, %s901_s9, %s902_s10  }
 0x100   :  { %898 = dma.done.wait [#allocation3], 16384  }
 0x101   :  { %899 = vsyncadd [#allocation3], 4294950912 }
 0x102   :  { %874 = vsyncpa [#allocation3], 1 }

</bundles_post_ra>
